<compile_context>
chip_gen: v5e
topology: v5e:2x2
jax: 0.10.0
libtpu: 0.0.40
codegen_flags: <defaults>
</compile_context>

<pallas_src>
import jax
import jax.numpy as jnp
from jax import lax
from jax.experimental import pallas as pl
from jax.experimental.pallas import tpu as pltpu

INPUT_DIM = 32   # stands in for X_train.shape[1]
H1, H2, H3, OUT = 128, 64, 32, 1

TILE_B_MAX = 1024  # batch rows per grid step (multiple of 128; ~tiny vs VMEM)


def _round_up(x, m):
    return ((x + m - 1) // m) * m


def mlp_kernel(x_ref,
               w1_ref, b1_ref,
               w2_ref, b2_ref,
               w3_ref, b3_ref,
               w4_ref, b4_ref,
               o_ref):
    # x: (TILE_B, INPUT_DIM)
    x = x_ref[...]

    h = jnp.dot(x, w1_ref[...], preferred_element_type=jnp.float32) + b1_ref[...]
    h = jnp.maximum(h, 0.0)

    h = jnp.dot(h, w2_ref[...], preferred_element_type=jnp.float32) + b2_ref[...]
    h = jnp.maximum(h, 0.0)

    h = jnp.dot(h, w3_ref[...], preferred_element_type=jnp.float32) + b3_ref[...]
    h = jnp.maximum(h, 0.0)                      # (TILE_B, H3)

    # fc4 (32 -> 1): contract the feature axis of h against the (1, 32) weight
    # row so the result comes out as (1, TILE_B) -- batch on lanes -> the
    # output store is lane-dense instead of a 1-lane masked vst.
    y = lax.dot_general(w4_ref[...], h,
                        dimension_numbers=(((1,), (1,)), ((), ())),
                        preferred_element_type=jnp.float32)   # (1, TILE_B)
    o_ref[...] = (y + b4_ref[...]).astype(o_ref.dtype)


def nn_model_forward(x, params, *, tile_b_max=TILE_B_MAX):
    """x: (B, INPUT_DIM) float32; params: dict of weights/biases.

    Weights are stored transposed vs. PyTorch, i.e. (in, out); biases are
    (1, out).  fc4's weight is stored as a (1, 32) row, bias as (1, 1).
    Returns (B, 1) float32, identical math to the PyTorch forward.
    """
    B, in_dim = x.shape
    assert in_dim == INPUT_DIM

    # Pad batch up to a multiple of the (128-aligned) batch tile.
    b_pad = _round_up(max(B, 1), 128)
    tile_b = min(tile_b_max, b_pad)
    b_pad = _round_up(b_pad, tile_b)
    if b_pad != B:
        x = jnp.pad(x, ((0, b_pad - B), (0, 0)))
    num_tiles = b_pad // tile_b

    in_specs = [
        pl.BlockSpec((tile_b, INPUT_DIM), lambda i: (i, 0)),  # x: tiled over batch
        pl.BlockSpec((INPUT_DIM, H1), lambda i: (0, 0)),      # w1 (resident)
        pl.BlockSpec((1, H1), lambda i: (0, 0)),              # b1
        pl.BlockSpec((H1, H2), lambda i: (0, 0)),             # w2
        pl.BlockSpec((1, H2), lambda i: (0, 0)),              # b2
        pl.BlockSpec((H2, H3), lambda i: (0, 0)),             # w3
        pl.BlockSpec((1, H3), lambda i: (0, 0)),              # b3
        pl.BlockSpec((1, H3), lambda i: (0, 0)),              # w4 (row form)
        pl.BlockSpec((1, 1), lambda i: (0, 0)),               # b4
    ]
    # Lane-dense output slab: (1, B_pad), one (1, TILE_B) block per grid step.
    out_specs = pl.BlockSpec((1, tile_b), lambda i: (0, i))

    out_slab = pl.pallas_call(
        mlp_kernel,
        out_shape=jax.ShapeDtypeStruct((1, b_pad), jnp.float32),
        grid_spec=pltpu.PrefetchScalarGridSpec(
            num_scalar_prefetch=0,
            grid=(num_tiles,),
            in_specs=in_specs,
            out_specs=out_specs,
        ),
        compiler_params=pltpu.CompilerParams(
            dimension_semantics=("parallel",),        # shard batch tiles across TCs
            vmem_limit_bytes=32 * 1024 * 1024,        # safe on v7x's 64 MiB VMEM
        ),
    )(x,
      params["w1"], params["b1"],
      params["w2"], params["b2"],
      params["w3"], params["b3"],
      params["w4"], params["b4"])

    return out_slab[0, :B].reshape(B, OUT)


def init_params(key):
    """Deterministic init mirroring nn.Linear shapes (weights stored (in, out);
    fc4 weight stored as a (1, 32) row, bias as (1, 1))."""
    keys = jax.random.split(key, 8)

    def linear(kw, kb, fan_in, fan_out):
        # Uniform(-1/sqrt(fan_in), 1/sqrt(fan_in)), like PyTorch's default.
        bound = 1.0 / jnp.sqrt(jnp.float32(fan_in))
        w = jax.random.uniform(kw, (fan_in, fan_out), jnp.float32, -bound, bound)
        b = jax.random.uniform(kb, (1, fan_out), jnp.float32, -bound, bound)
        return w, b

    w1, b1 = linear(keys[0], keys[1], INPUT_DIM, H1)
    w2, b2 = linear(keys[2], keys[3], H1, H2)
    w3, b3 = linear(keys[4], keys[5], H2, H3)
    w4_col, b4 = linear(keys[6], keys[7], H3, OUT)      # (32, 1), (1, 1)
    w4 = w4_col.T                                        # store as (1, 32) row
    return {"w1": w1, "b1": b1, "w2": w2, "b2": b2,
            "w3": w3, "b3": b3, "w4": w4, "b4": b4}


if __name__ == "__main__":
    key = jax.random.PRNGKey(0)
    k_params, k_x = jax.random.split(key)

    params = init_params(k_params)
    batch = 16              # small test batch (padded to one 128-row tile)
    x = jax.random.normal(k_x, (batch, INPUT_DIM), jnp.float32)

    out = nn_model_forward(x, params)
    jax.block_until_ready(out)

    # Pure-JAX reference check of the same math.
    def ref(x, p):
        h = jnp.maximum(x @ p["w1"] + p["b1"], 0.0)
        h = jnp.maximum(h @ p["w2"] + p["b2"], 0.0)
        h = jnp.maximum(h @ p["w3"] + p["b3"], 0.0)
        return h @ p["w4"].T + p["b4"]

    expected = ref(x, params)
    assert out.shape == (batch, OUT)
    assert jnp.allclose(out, expected, atol=1e-4, rtol=1e-4), (
        float(jnp.max(jnp.abs(out - expected))))

    print("KERNEL_OK")
</pallas_src>

<mosaic_0001>
module attributes {stable_mosaic.version = 11 : i64} {
  func.func @mlp_kernel(%arg0: i32, %arg1: memref<128x32xf32, #tpu.memory_space<vmem>>, %arg2: memref<32x128xf32, #tpu.memory_space<vmem>>, %arg3: memref<1x128xf32, #tpu.memory_space<vmem>>, %arg4: memref<128x64xf32, #tpu.memory_space<vmem>>, %arg5: memref<1x64xf32, #tpu.memory_space<vmem>>, %arg6: memref<64x32xf32, #tpu.memory_space<vmem>>, %arg7: memref<1x32xf32, #tpu.memory_space<vmem>>, %arg8: memref<1x32xf32, #tpu.memory_space<vmem>>, %arg9: memref<1x1xf32, #tpu.memory_space<vmem>>, %arg10: memref<1x128xf32, #tpu.memory_space<vmem>>) attributes {dimension_semantics = [#tpu.dimension_semantics<parallel>], iteration_bounds = array<i64: 1>, scalar_prefetch = 0 : i64, scratch_operands = 0 : i64, tpu.core_type = #tpu.core_type<tc>, window_params = [{transform_indices = @transform_0, window_bounds = array<i64: 128, 32>}, {pipeline_mode = #tpu.pipeline_mode<synchronous>, transform_indices = @transform_1, window_bounds = array<i64: 32, 128>}, {pipeline_mode = #tpu.pipeline_mode<synchronous>, transform_indices = @transform_2, window_bounds = array<i64: 1, 128>}, {pipeline_mode = #tpu.pipeline_mode<synchronous>, transform_indices = @transform_3, window_bounds = array<i64: 128, 64>}, {pipeline_mode = #tpu.pipeline_mode<synchronous>, transform_indices = @transform_4, window_bounds = array<i64: 1, 64>}, {pipeline_mode = #tpu.pipeline_mode<synchronous>, transform_indices = @transform_5, window_bounds = array<i64: 64, 32>}, {pipeline_mode = #tpu.pipeline_mode<synchronous>, transform_indices = @transform_6, window_bounds = array<i64: 1, 32>}, {pipeline_mode = #tpu.pipeline_mode<synchronous>, transform_indices = @transform_7, window_bounds = array<i64: 1, 32>}, {pipeline_mode = #tpu.pipeline_mode<synchronous>, transform_indices = @transform_8, window_bounds = array<i64: 1, 1>}, {transform_indices = @transform_9, window_bounds = array<i64: 1, 128>}]} {
    %c0 = arith.constant 0 : index
    %c0_0 = arith.constant 0 : index
    %0 = vector.load %arg1[%c0, %c0_0] : memref<128x32xf32, #tpu.memory_space<vmem>>, vector<128x32xf32>
    %c0_1 = arith.constant 0 : index
    %c0_2 = arith.constant 0 : index
    %1 = vector.load %arg2[%c0_1, %c0_2] : memref<32x128xf32, #tpu.memory_space<vmem>>, vector<32x128xf32>
    %cst = arith.constant dense<0.000000e+00> : vector<128x128xf32>
    %2 = tpu.matmul %0, %1, %cst {dimension_numbers = #tpu.dot_dimension_numbers<[1], [0], [0], [1], [0, 0, 1, 1], [], []>} : vector<128x32xf32>, vector<32x128xf32>, vector<128x128xf32> -> vector<128x128xf32>
    %c0_3 = arith.constant 0 : index
    %c0_4 = arith.constant 0 : index
    %3 = vector.load %arg3[%c0_3, %c0_4] : memref<1x128xf32, #tpu.memory_space<vmem>>, vector<1x128xf32>
    %4 = vector.broadcast %3 : vector<1x128xf32> to vector<128x128xf32>
    %5 = arith.addf %2, %4 : vector<128x128xf32>
    %cst_5 = arith.constant 0.000000e+00 : f32
    %6 = vector.broadcast %cst_5 : f32 to vector<128x128xf32>
    %7 = arith.maximumf %5, %6 : vector<128x128xf32>
    %c0_6 = arith.constant 0 : index
    %c0_7 = arith.constant 0 : index
    %8 = vector.load %arg4[%c0_6, %c0_7] : memref<128x64xf32, #tpu.memory_space<vmem>>, vector<128x64xf32>
    %cst_8 = arith.constant dense<0.000000e+00> : vector<128x64xf32>
    %9 = tpu.matmul %7, %8, %cst_8 {dimension_numbers = #tpu.dot_dimension_numbers<[1], [0], [0], [1], [0, 0, 1, 1], [], []>} : vector<128x128xf32>, vector<128x64xf32>, vector<128x64xf32> -> vector<128x64xf32>
    %c0_9 = arith.constant 0 : index
    %c0_10 = arith.constant 0 : index
    %10 = vector.load %arg5[%c0_9, %c0_10] : memref<1x64xf32, #tpu.memory_space<vmem>>, vector<1x64xf32>
    %11 = vector.broadcast %10 : vector<1x64xf32> to vector<128x64xf32>
    %12 = arith.addf %9, %11 : vector<128x64xf32>
    %cst_11 = arith.constant 0.000000e+00 : f32
    %13 = vector.broadcast %cst_11 : f32 to vector<128x64xf32>
    %14 = arith.maximumf %12, %13 : vector<128x64xf32>
    %c0_12 = arith.constant 0 : index
    %c0_13 = arith.constant 0 : index
    %15 = vector.load %arg6[%c0_12, %c0_13] : memref<64x32xf32, #tpu.memory_space<vmem>>, vector<64x32xf32>
    %cst_14 = arith.constant dense<0.000000e+00> : vector<128x32xf32>
    %16 = tpu.matmul %14, %15, %cst_14 {dimension_numbers = #tpu.dot_dimension_numbers<[1], [0], [0], [1], [0, 0, 1, 1], [], []>} : vector<128x64xf32>, vector<64x32xf32>, vector<128x32xf32> -> vector<128x32xf32>
    %c0_15 = arith.constant 0 : index
    %c0_16 = arith.constant 0 : index
    %17 = vector.load %arg7[%c0_15, %c0_16] : memref<1x32xf32, #tpu.memory_space<vmem>>, vector<1x32xf32>
    %18 = vector.broadcast %17 : vector<1x32xf32> to vector<128x32xf32>
    %19 = arith.addf %16, %18 : vector<128x32xf32>
    %cst_17 = arith.constant 0.000000e+00 : f32
    %20 = vector.broadcast %cst_17 : f32 to vector<128x32xf32>
    %21 = arith.maximumf %19, %20 : vector<128x32xf32>
    %c0_18 = arith.constant 0 : index
    %c0_19 = arith.constant 0 : index
    %22 = vector.load %arg8[%c0_18, %c0_19] : memref<1x32xf32, #tpu.memory_space<vmem>>, vector<1x32xf32>
    %cst_20 = arith.constant dense<0.000000e+00> : vector<1x128xf32>
    %23 = tpu.matmul %22, %21, %cst_20 {dimension_numbers = #tpu.dot_dimension_numbers<[1], [1], [0], [0], [0, 0, 1, 0], [], []>} : vector<1x32xf32>, vector<128x32xf32>, vector<1x128xf32> -> vector<1x128xf32>
    %c0_21 = arith.constant 0 : index
    %c0_22 = arith.constant 0 : index
    %24 = vector.load %arg9[%c0_21, %c0_22] : memref<1x1xf32, #tpu.memory_space<vmem>>, vector<1x1xf32>
    %25 = vector.broadcast %24 : vector<1x1xf32> to vector<1x128xf32>
    %26 = arith.addf %23, %25 : vector<1x128xf32>
    %c0_23 = arith.constant 0 : index
    %c0_24 = arith.constant 0 : index
    %27 = vector.load %arg10[%c0_23, %c0_24] : memref<1x128xf32, #tpu.memory_space<vmem>>, vector<1x128xf32>
    tpu.vector_store %arg10[%c0_23, %c0_24], %26 {strides = array<i32>} : memref<1x128xf32, #tpu.memory_space<vmem>>, vector<1x128xf32>,
    return
  }
  func.func @transform_0(%arg0: i32) -> (i32, i32) {
    %c0_i32 = arith.constant 0 : i32
    %c0_i32_0 = arith.constant 0 : i32
    return %arg0, %c0_i32 : i32, i32
  }
  func.func @transform_1(%arg0: i32) -> (i32, i32) {
    %c0_i32 = arith.constant 0 : i32
    %c0_i32_0 = arith.constant 0 : i32
    %c0_i32_1 = arith.constant 0 : i32
    return %c0_i32, %c0_i32_0 : i32, i32
  }
  func.func @transform_2(%arg0: i32) -> (i32, i32) {
    %c0_i32 = arith.constant 0 : i32
    %c0_i32_0 = arith.constant 0 : i32
    %c0_i32_1 = arith.constant 0 : i32
    return %c0_i32, %c0_i32_0 : i32, i32
  }
  func.func @transform_3(%arg0: i32) -> (i32, i32) {
    %c0_i32 = arith.constant 0 : i32
    %c0_i32_0 = arith.constant 0 : i32
    %c0_i32_1 = arith.constant 0 : i32
    return %c0_i32, %c0_i32_0 : i32, i32
  }
  func.func @transform_4(%arg0: i32) -> (i32, i32) {
    %c0_i32 = arith.constant 0 : i32
    %c0_i32_0 = arith.constant 0 : i32
    %c0_i32_1 = arith.constant 0 : i32
    return %c0_i32, %c0_i32_0 : i32, i32
  }
  func.func @transform_5(%arg0: i32) -> (i32, i32) {
    %c0_i32 = arith.constant 0 : i32
    %c0_i32_0 = arith.constant 0 : i32
    %c0_i32_1 = arith.constant 0 : i32
    return %c0_i32, %c0_i32_0 : i32, i32
  }
  func.func @transform_6(%arg0: i32) -> (i32, i32) {
    %c0_i32 = arith.constant 0 : i32
    %c0_i32_0 = arith.constant 0 : i32
    %c0_i32_1 = arith.constant 0 : i32
    return %c0_i32, %c0_i32_0 : i32, i32
  }
  func.func @transform_7(%arg0: i32) -> (i32, i32) {
    %c0_i32 = arith.constant 0 : i32
    %c0_i32_0 = arith.constant 0 : i32
    %c0_i32_1 = arith.constant 0 : i32
    return %c0_i32, %c0_i32_0 : i32, i32
  }
  func.func @transform_8(%arg0: i32) -> (i32, i32) {
    %c0_i32 = arith.constant 0 : i32
    %c0_i32_0 = arith.constant 0 : i32
    %c0_i32_1 = arith.constant 0 : i32
    return %c0_i32, %c0_i32_0 : i32, i32
  }
  func.func @transform_9(%arg0: i32) -> (i32, i32) {
    %c0_i32 = arith.constant 0 : i32
    %c0_i32_0 = arith.constant 0 : i32
    return %c0_i32, %arg0 : i32, i32
  }
}

</mosaic_0001>

<bundles_post_ra>
// kernel: tpu_custom_call.1
= control target key start
LH: loop header
LB: loop body
LE: loop exit
PB: predicated region body
PF: predicated region fallthrough
CT: control target
= control target key end

     0   :  { %s899_s0 = inlined_call_operand.vmem [shape: f32[128,32], index: 0, kind: input, shape index: {}]   ;;  %s900_s1 = inlined_call_operand.vmem [shape: f32[32,128], index: 1, kind: input, shape index: {}]   ;;  %s901_s2 = inlined_call_operand.vmem [shape: f32[1,128], index: 2, kind: input, shape index: {}]   ;;  %s902_s3 = inlined_call_operand.vmem [shape: f32[128,64], index: 3, kind: input, shape index: {}]   ;;  %s903_s4 = inlined_call_operand.vmem [shape: f32[1,64], index: 4, kind: input, shape index: {}]   ;;  %s904_s5 = inlined_call_operand.vmem [shape: f32[64,32], index: 5, kind: input, shape index: {}]   ;;  %s905_s6 = inlined_call_operand.vmem [shape: f32[1,32], index: 6, kind: input, shape index: {}]   ;;  %s906_s7 = inlined_call_operand.vmem [shape: f32[1,32], index: 7, kind: input, shape index: {}]   ;;  %s907_s8 = inlined_call_operand.<no memory space> [shape: f32[1,1], index: 8, kind: input, shape index: {}]   ;;  %s908_s9 = inlined_call_operand.hbm [shape: f32[1,128], index: 9, kind: output, shape index: {}]  }
   0x1   :  { %v14_v0 = vstv %s907_s8 }
   0x2   :  { %15 = vst [vmem:[#allocation2] sm:$0x1] %v14_v0 }
   0x3   :  { %v54_v1 = vld [vmem:[%s900_s1 + $0x18] sm:$0xff]  ;;  %v53_v2 = vld [vmem:[%s900_s1 + $0x10] sm:$0xff]  ;;  %v52_v3 = vld [vmem:[%s900_s1 + $0x8] sm:$0xff] }
   0x4   :  { %120 = vmatpush.msra.mxu0 %v54_v1  ;;  %v51_v4 = vld [vmem:[%s900_s1] sm:$0xff] }
   0x6   :  { %121 = vmatpush.msra.mxu0 %v53_v2 }
   0x7   :  { %16 = vsyncpa [#allocation4], 0  ;;  %v35_v5 = vld [vmem:[%s899_s0] sm:$0xff]  ;;  %vm59_vm0 = vcmask 261120   ;;  %v36_v6 = vld [vmem:[%s899_s0 + $0x8] sm:$0xff]  ;;  %vm302_vm1 = vcmask 523264  }
   0x8   :  { %122 = vmatpush.msra.mxu0 %v52_v3  ;;  %v37_v7 = vld [vmem:[%s899_s0 + $0x10] sm:$0xff]  ;;  %v38_v8 = vld [vmem:[%s899_s0 + $0x18] sm:$0xff]  ;;  %v39_v9 = vld [vmem:[%s899_s0 + $0x20] sm:$0xff]  ;;  %s610_s30 = smov [#allocation3]   ;;  %s519_s13 = sshll.u32 %s908_s9, 4  ;;  %s520_s13 = int_to_ptr.hbm [resolvable:$true] %s519_s13 }
   0x9   :  { %v40_v10 = vld [vmem:[%s899_s0 + $0x28] sm:$0xff]  ;;  %v41_v11 = vld [vmem:[%s899_s0 + $0x30] sm:$0xff]  ;;  %v42_v12 = vld [vmem:[%s899_s0 + $0x38] sm:$0xff]  ;;  %s517_s10 = sshll.u32 %s610_s30, 4  ;;  %s518_s10 = int_to_ptr.vmem [resolvable:$true] %s517_s10 }
   0xa   :  { %123 = vmatpush.msra.mxu0 %v51_v4  ;;  %v43_v13 = vld [vmem:[%s899_s0 + $0x40] sm:$0xff]  ;;  %v204_v14 = vld [vmem:[%s902_s3 + $0x78] sm:$0xff]  ;;  %v203_v15 = vld [vmem:[%s902_s3 + $0x70] sm:$0xff] }
   0xb   :  { %528 = vmatmul.msk.f32.vlgmr.msra.gmra.mxu0 %vm59_vm0, %v35_v5  ;;  %209 = vmatpush.msra.mxu1 %v204_v14  ;;  %v202_v16 = vld [vmem:[%s902_s3 + $0x68] sm:$0xff]  ;;  %v201_v18 = vld [vmem:[%s902_s3 + $0x60] sm:$0xff]  ;;  %v200_v19 = vld [vmem:[%s902_s3 + $0x58] sm:$0xff] }
   0xc   :  { %v44_v17 = vld [vmem:[%s899_s0 + $0x48] sm:$0xff]  ;;  %v199_v20 = vld [vmem:[%s902_s3 + $0x50] sm:$0xff]  ;;  %v197_v23 = vld [vmem:[%s902_s3 + $0x40] sm:$0xff] }
   0xd   :  { %210 = vmatpush.msra.mxu1 %v203_v15  ;;  %v198_v21 = vld [vmem:[%s902_s3 + $0x48] sm:$0xff]  ;;  %v45_v22 = vld [vmem:[%s899_s0 + $0x50] sm:$0xff]  ;;  %v196_v24 = vld [vmem:[%s902_s3 + $0x38] sm:$0xff] }
   0xe   :  { %v195_v25 = vld [vmem:[%s902_s3 + $0x30] sm:$0xff]  ;;  %v194_v26 = vld [vmem:[%s902_s3 + $0x28] sm:$0xff]  ;;  %v46_v27 = vld [vmem:[%s899_s0 + $0x58] sm:$0xff] }
   0xf   :  { %211 = vmatpush.msra.mxu1 %v202_v16  ;;  %v193_v28 = vld [vmem:[%s902_s3 + $0x20] sm:$0xff]  ;;  %v192_v29 = vld [vmem:[%s902_s3 + $0x18] sm:$0xff]  ;;  %v191_v30 = vld [vmem:[%s902_s3 + $0x10] sm:$0xff] }
  0x10   :  { %v47_v31 = vld [vmem:[%s899_s0 + $0x60] sm:$0xff]  ;;  %v190_v32 = vld [vmem:[%s902_s3 + $0x8] sm:$0xff]  ;;  %v49_v35 = vld [vmem:[%s899_s0 + $0x70] sm:$0xff] }
  0x11   :  { %212 = vmatpush.msra.mxu1 %v201_v18  ;;  %v189_v33 = vld [vmem:[%s902_s3] sm:$0xff]  ;;  %v48_v34 = vld [vmem:[%s899_s0 + $0x68] sm:$0xff]  ;;  %v50_v36 = vld [vmem:[%s899_s0 + $0x78] sm:$0xff] }
  0x12   :  { %v791_v37 = vld [vmem:[%s901_s2] ss:$0 sm:$0xff]  ;;  %v293_v14 = vld [vmem:[%s904_s5 + $0x18] sm:$0xff] }
  0x13   :  { %529 = vmatmul.msk.f32.gmra.mxu0 %vm59_vm0, %v36_v6  ;;  %213 = vmatpush.msra.mxu1 %v200_v19  ;;  %v291_v19 = vld [vmem:[%s904_s5 + $0x8] sm:$0xff] }
  0x15   :  { %214 = vmatpush.msra.mxu1 %v199_v20  ;;  %v290_v20 = vld [vmem:[%s904_s5] sm:$0xff] }
  0x17   :  { %215 = vmatpush.msra.mxu1 %v198_v21 }
  0x19   :  { %216 = vmatpush.msra.mxu1 %v197_v23 }
  0x1b   :  { %530 = vmatmul.msk.f32.gmra.mxu0 %vm59_vm0, %v37_v7  ;;  %217 = vmatpush.msra.mxu1 %v196_v24  ;;  %v297_v7 = vld [vmem:[%s904_s5 + $0x38] sm:$0xff] }
  0x1c   :  { %359 = vmatpush.msra.mxu2 %v297_v7 }
  0x1d   :  { %218 = vmatpush.msra.mxu1 %v195_v25 }
  0x1f   :  { %219 = vmatpush.msra.mxu1 %v194_v26 }
  0x21   :  { %220 = vmatpush.msra.mxu1 %v193_v28 }
  0x23   :  { %531 = vmatmul.msk.f32.gmra.mxu0 %vm59_vm0, %v38_v8  ;;  %221 = vmatpush.msra.mxu1 %v192_v29 }
  0x25   :  { %222 = vmatpush.msra.mxu1 %v191_v30  ;;  %v836_v30 = vld [vmem:[%s903_s4] ss:$0 sm:$0xff] }
  0x27   :  { %223 = vmatpush.msra.mxu1 %v190_v32 }
  0x29   :  { %224 = vmatpush.msra.mxu1 %v189_v33 }
  0x2b   :  { %532 = vmatmul.msk.f32.gmra.mxu0 %vm59_vm0, %v39_v9 }
  0x33   :  { %533 = vmatmul.msk.f32.gmra.mxu0 %vm59_vm0, %v40_v10  ;;  %v296_v10 = vld [vmem:[%s904_s5 + $0x30] sm:$0xff] }
  0x34   :  { %360 = vmatpush.msra.mxu2 %v296_v10 }
  0x3b   :  { %534 = vmatmul.msk.f32.gmra.mxu0 %vm59_vm0, %v41_v11 }
  0x43   :  { %535 = vmatmul.msk.f32.gmra.mxu0 %vm59_vm0, %v42_v12  ;;  %v295_v12 = vld [vmem:[%s904_s5 + $0x28] sm:$0xff] }
  0x44   :  { %361 = vmatpush.msra.mxu2 %v295_v12 }
  0x4b   :  { %536 = vmatmul.msk.f32.gmra.mxu0 %vm59_vm0, %v43_v13  ;;  %v294_v13 = vld [vmem:[%s904_s5 + $0x20] sm:$0xff] }
  0x4c   :  { %362 = vmatpush.msra.mxu2 %v294_v13 }
  0x4e   :  { %363 = vmatpush.msra.mxu2 %v293_v14 }
  0x53   :  { %537 = vmatmul.msk.f32.gmra.mxu0 %vm59_vm0, %v44_v17  ;;  %v292_v17 = vld [vmem:[%s904_s5 + $0x10] sm:$0xff] }
  0x54   :  { %364 = vmatpush.msra.mxu2 %v292_v17 }
  0x56   :  { %365 = vmatpush.msra.mxu2 %v291_v19 }
  0x58   :  { %366 = vmatpush.msra.mxu2 %v290_v20 }
  0x5b   :  { %538 = vmatmul.msk.f32.gmra.mxu0 %vm59_vm0, %v45_v22 }
  0x63   :  { %539 = vmatmul.msk.f32.gmra.mxu0 %vm59_vm0, %v46_v27 }
  0x6b   :  { %540 = vmatmul.msk.f32.gmra.mxu0 %vm59_vm0, %v47_v31 }
  0x73   :  { %541 = vmatmul.msk.f32.gmra.mxu0 %vm59_vm0, %v48_v34 }
  0x7b   :  { %542 = vmatmul.msk.f32.gmra.mxu0 %vm59_vm0, %v49_v35 }
  0x83   :  { %543 = vmatmul.msk.f32.gmra.mxu0 %vm59_vm0, %v50_v36 }
  0x88   :  { %v125_v38 = vpop.f32.mrf.mxu0 }
  0x89   :  { %v126_v39 = vadd.f32 %v791_v37, %v125_v38 }
  0x8b   :  { %v173_v40 = vmax.f32 %v126_v39, 0.0 }
  0x8d   :  { %225 = vmatmul.f32.vlgmr.msra.gmra.mxu1 %v173_v40 }
  0x90   :  { %v128_v41 = vpop.f32.mrf.mxu0 }
  0x91   :  { %v129_v42 = vadd.f32 %v791_v37, %v128_v41 }
  0x93   :  { %v174_v43 = vmax.f32 %v129_v42, 0.0 }
  0x95   :  { %228 = vmatmul.f32.gmra.mxu1 %v174_v43 }
  0x98   :  { %v131_v44 = vpop.f32.mrf.mxu0 }
  0x99   :  { %v132_v45 = vadd.f32 %v791_v37, %v131_v44 }
  0x9b   :  { %v175_v46 = vmax.f32 %v132_v45, 0.0 }
  0x9d   :  { %231 = vmatmul.f32.gmra.mxu1 %v175_v46 }
  0xa0   :  { %v134_v47 = vpop.f32.mrf.mxu0 }
  0xa1   :  { %v135_v48 = vadd.f32 %v791_v37, %v134_v47 }
  0xa3   :  { %v176_v49 = vmax.f32 %v135_v48, 0.0 }
  0xa5   :  { %234 = vmatmul.f32.gmra.mxu1 %v176_v49 }
  0xa8   :  { %v137_v50 = vpop.f32.mrf.mxu0 }
  0xa9   :  { %v138_v51 = vadd.f32 %v791_v37, %v137_v50 }
  0xab   :  { %v177_v52 = vmax.f32 %v138_v51, 0.0 }
  0xad   :  { %237 = vmatmul.f32.gmra.mxu1 %v177_v52 }
  0xb0   :  { %v140_v53 = vpop.f32.mrf.mxu0 }
  0xb1   :  { %v141_v54 = vadd.f32 %v791_v37, %v140_v53 }
  0xb3   :  { %v178_v55 = vmax.f32 %v141_v54, 0.0 }
  0xb5   :  { %240 = vmatmul.f32.gmra.mxu1 %v178_v55 }
  0xb8   :  { %v143_v56 = vpop.f32.mrf.mxu0 }
  0xb9   :  { %v144_v57 = vadd.f32 %v791_v37, %v143_v56 }
  0xbb   :  { %v179_v58 = vmax.f32 %v144_v57, 0.0 }
  0xbd   :  { %243 = vmatmul.f32.gmra.mxu1 %v179_v58 }
  0xc0   :  { %v146_v59 = vpop.f32.mrf.mxu0 }
  0xc1   :  { %v147_v60 = vadd.f32 %v791_v37, %v146_v59 }
  0xc3   :  { %v180_v61 = vmax.f32 %v147_v60, 0.0 }
  0xc5   :  { %246 = vmatmul.f32.gmra.mxu1 %v180_v61 }
  0xc8   :  { %v149_v62 = vpop.f32.mrf.mxu0 }
  0xc9   :  { %v150_v63 = vadd.f32 %v791_v37, %v149_v62 }
  0xcb   :  { %v181_v0 = vmax.f32 %v150_v63, 0.0 }
  0xcd   :  { %249 = vmatmul.f32.gmra.mxu1 %v181_v0 }
  0xd0   :  { %v152_v1 = vpop.f32.mrf.mxu0 }
  0xd1   :  { %v153_v2 = vadd.f32 %v791_v37, %v152_v1 }
  0xd3   :  { %v182_v3 = vmax.f32 %v153_v2, 0.0 }
  0xd5   :  { %252 = vmatmul.f32.gmra.mxu1 %v182_v3 }
  0xd8   :  { %v155_v4 = vpop.f32.mrf.mxu0 }
  0xd9   :  { %v156_v5 = vadd.f32 %v791_v37, %v155_v4 }
  0xdb   :  { %v183_v6 = vmax.f32 %v156_v5, 0.0 }
  0xdd   :  { %255 = vmatmul.f32.gmra.mxu1 %v183_v6 }
  0xe0   :  { %v158_v8 = vpop.f32.mrf.mxu0 }
  0xe1   :  { %v159_v9 = vadd.f32 %v791_v37, %v158_v8 }
  0xe3   :  { %v184_v11 = vmax.f32 %v159_v9, 0.0 }
  0xe5   :  { %258 = vmatmul.f32.gmra.mxu1 %v184_v11 }
  0xe8   :  { %v161_v15 = vpop.f32.mrf.mxu0 }
  0xe9   :  { %v162_v16 = vadd.f32 %v791_v37, %v161_v15 }
  0xeb   :  { %v185_v18 = vmax.f32 %v162_v16, 0.0 }
  0xed   :  { %261 = vmatmul.f32.gmra.mxu1 %v185_v18 }
  0xf0   :  { %v164_v21 = vpop.f32.mrf.mxu0 }
  0xf1   :  { %v165_v22 = vadd.f32 %v791_v37, %v164_v21 }
  0xf3   :  { %v186_v23 = vmax.f32 %v165_v22, 0.0 }
  0xf5   :  { %264 = vmatmul.f32.gmra.mxu1 %v186_v23 }
  0xf8   :  { %v167_v24 = vpop.f32.mrf.mxu0 }
  0xf9   :  { %v168_v25 = vadd.f32 %v791_v37, %v167_v24 }
  0xfb   :  { %v187_v26 = vmax.f32 %v168_v25, 0.0 }
  0xfd   :  { %267 = vmatmul.f32.gmra.mxu1 %v187_v26 }
 0x100   :  { %v170_v27 = vpop.f32.mrf.mxu0 }
 0x101   :  { %v171_v28 = vadd.f32 %v791_v37, %v170_v27 }
 0x103   :  { %v188_v29 = vmax.f32 %v171_v28, 0.0 }
 0x105   :  { %270 = vmatmul.f32.gmra.mxu1 %v188_v29 }
 0x10a   :  { %v226_v31 = vpop.f32.mrf.mxu1 }
 0x10b   :  { %v227_v32 = vadd.f32 %v836_v30, %v226_v31 }
 0x10d   :  { %v274_v33 = vmax.f32 %v227_v32, 0.0 }
 0x10f   :  { %544 = vmatmul.msk.f32.vlgmr.msra.gmra.mxu2 %vm302_vm1, %v274_v33 }
 0x112   :  { %v229_v34 = vpop.f32.mrf.mxu1 }
 0x113   :  { %v230_v35 = vadd.f32 %v836_v30, %v229_v34 }
 0x115   :  { %v275_v36 = vmax.f32 %v230_v35, 0.0 }
 0x117   :  { %545 = vmatmul.msk.f32.gmra.mxu2 %vm302_vm1, %v275_v36 }
 0x11a   :  { %v232_v37 = vpop.f32.mrf.mxu1 }
 0x11b   :  { %v233_v38 = vadd.f32 %v836_v30, %v232_v37 }
 0x11d   :  { %v276_v39 = vmax.f32 %v233_v38, 0.0 }
 0x11f   :  { %546 = vmatmul.msk.f32.gmra.mxu2 %vm302_vm1, %v276_v39 }
 0x122   :  { %v235_v40 = vpop.f32.mrf.mxu1 }
 0x123   :  { %v236_v41 = vadd.f32 %v836_v30, %v235_v40 }
 0x125   :  { %v277_v42 = vmax.f32 %v236_v41, 0.0 }
 0x127   :  { %547 = vmatmul.msk.f32.gmra.mxu2 %vm302_vm1, %v277_v42 }
 0x12a   :  { %v238_v43 = vpop.f32.mrf.mxu1 }
 0x12b   :  { %v239_v44 = vadd.f32 %v836_v30, %v238_v43 }
 0x12d   :  { %v278_v45 = vmax.f32 %v239_v44, 0.0 }
 0x12f   :  { %548 = vmatmul.msk.f32.gmra.mxu2 %vm302_vm1, %v278_v45 }
 0x132   :  { %v241_v46 = vpop.f32.mrf.mxu1 }
 0x133   :  { %v242_v47 = vadd.f32 %v836_v30, %v241_v46 }
 0x135   :  { %v279_v48 = vmax.f32 %v242_v47, 0.0 }
 0x137   :  { %549 = vmatmul.msk.f32.gmra.mxu2 %vm302_vm1, %v279_v48 }
 0x13a   :  { %v244_v49 = vpop.f32.mrf.mxu1 }
 0x13b   :  { %v245_v50 = vadd.f32 %v836_v30, %v244_v49 }
 0x13d   :  { %v280_v51 = vmax.f32 %v245_v50, 0.0 }
 0x13f   :  { %550 = vmatmul.msk.f32.gmra.mxu2 %vm302_vm1, %v280_v51  ;;  %v433_v51 = vld [vmem:[#allocation2] sm:$0x1] }
 0x142   :  { %v247_v52 = vpop.f32.mrf.mxu1 }
 0x143   :  { %v248_v53 = vadd.f32 %v836_v30, %v247_v52  ;;  %v609_v52 = vmov 0  }
 0x144   :  { %579 = vset.pattern.permute.xlu0 %v609_v52 }
 0x145   :  { %v281_v54 = vmax.f32 %v248_v53, 0.0  ;;  %436 = vperm.xlu0 %579, %v433_v51  }
 0x147   :  { %551 = vmatmul.msk.f32.gmra.mxu2 %vm302_vm1, %v281_v54 }
 0x14a   :  { %v250_v55 = vpop.f32.mrf.mxu1 }
 0x14b   :  { %v251_v56 = vadd.f32 %v836_v30, %v250_v55 }
 0x14d   :  { %v282_v57 = vmax.f32 %v251_v56, 0.0 }
 0x14f   :  { %552 = vmatmul.msk.f32.gmra.mxu2 %vm302_vm1, %v282_v57 }
 0x152   :  { %v253_v58 = vpop.f32.mrf.mxu1 }
 0x153   :  { %v254_v59 = vadd.f32 %v836_v30, %v253_v58 }
 0x155   :  { %v283_v60 = vmax.f32 %v254_v59, 0.0 }
 0x157   :  { %553 = vmatmul.msk.f32.gmra.mxu2 %vm302_vm1, %v283_v60 }
 0x15a   :  { %v256_v61 = vpop.f32.mrf.mxu1 }
 0x15b   :  { %v257_v62 = vadd.f32 %v836_v30, %v256_v61 }
 0x15d   :  { %v284_v63 = vmax.f32 %v257_v62, 0.0 }
 0x15f   :  { %554 = vmatmul.msk.f32.gmra.mxu2 %vm302_vm1, %v284_v63 }
 0x162   :  { %v259_v0 = vpop.f32.mrf.mxu1 }
 0x163   :  { %v260_v1 = vadd.f32 %v836_v30, %v259_v0 }
 0x165   :  { %v285_v2 = vmax.f32 %v260_v1, 0.0 }
 0x167   :  { %555 = vmatmul.msk.f32.gmra.mxu2 %vm302_vm1, %v285_v2  ;;  %v432_v2 = vld [vmem:[%s906_s7] sm:$0x1] }
 0x16a   :  { %v262_v3 = vpop.f32.mrf.mxu1 }
 0x16b   :  { %v263_v4 = vadd.f32 %v836_v30, %v262_v3 }
 0x16d   :  { %v286_v5 = vmax.f32 %v263_v4, 0.0 }
 0x16f   :  { %556 = vmatmul.msk.f32.gmra.mxu2 %vm302_vm1, %v286_v5 }
 0x172   :  { %v265_v6 = vpop.f32.mrf.mxu1 }
 0x173   :  { %v266_v7 = vadd.f32 %v836_v30, %v265_v6 }
 0x175   :  { %v287_v8 = vmax.f32 %v266_v7, 0.0 }
 0x177   :  { %557 = vmatmul.msk.f32.gmra.mxu2 %vm302_vm1, %v287_v8 }
 0x17a   :  { %v268_v9 = vpop.f32.mrf.mxu1 }
 0x17b   :  { %v269_v10 = vadd.f32 %v836_v30, %v268_v9 }
 0x17d   :  { %v288_v11 = vmax.f32 %v269_v10, 0.0 }
 0x17f   :  { %558 = vmatmul.msk.f32.gmra.mxu2 %vm302_vm1, %v288_v11 }
 0x182   :  { %v271_v12 = vpop.f32.mrf.mxu1 }
 0x183   :  { %v272_v13 = vadd.f32 %v836_v30, %v271_v12  ;;  %v582_v30 = vld [vmem:[%s905_s6] ss:$0 sm:$0xff] }
 0x185   :  { %v289_v14 = vmax.f32 %v272_v13, 0.0 }
 0x187   :  { %559 = vmatmul.msk.f32.gmra.mxu2 %vm302_vm1, %v289_v14 }
 0x192   :  { %v870_v15 = vpop.f32.mrf.mxu2 }
 0x193   :  { %v369_v63 = vadd.f32 %v582_v30, %v870_v15 }
 0x195   :  { %v416_v1 = vmax.f32 %v369_v63, 0.0 }
 0x19a   :  { %v371_v16 = vpop.f32.mrf.mxu2 }
 0x19b   :  { %v372_v61 = vadd.f32 %v582_v30, %v371_v16 }
 0x19d   :  { %v417_v0 = vmax.f32 %v372_v61, 0.0 }
 0x1a2   :  { %v374_v17 = vpop.f32.mrf.mxu2 }
 0x1a3   :  { %v375_v59 = vadd.f32 %v582_v30, %v374_v17 }
 0x1a5   :  { %v418_v62 = vmax.f32 %v375_v59, 0.0 }
 0x1aa   :  { %v377_v18 = vpop.f32.mrf.mxu2 }
 0x1ab   :  { %v378_v57 = vadd.f32 %v582_v30, %v377_v18 }
 0x1ad   :  { %v419_v60 = vmax.f32 %v378_v57, 0.0 }
 0x1b2   :  { %v380_v19 = vpop.f32.mrf.mxu2 }
 0x1b3   :  { %v381_v55 = vadd.f32 %v582_v30, %v380_v19 }
 0x1b5   :  { %v420_v58 = vmax.f32 %v381_v55, 0.0 }
 0x1b7   :  { %v437_v3 = vpop.permute.xlu0 %436 }
 0x1b8   :  { %v439_v4 = vperm.slane %v437_v3, 0 }
 0x1ba   :  { %v383_v20 = vpop.f32.mrf.mxu2 }
 0x1bb   :  { %v384_v53 = vadd.f32 %v582_v30, %v383_v20 }
 0x1bd   :  { %v421_v56 = vmax.f32 %v384_v53, 0.0 }
 0x1c2   :  { %v386_v21 = vpop.f32.mrf.mxu2 }
 0x1c3   :  { %v387_v49 = vadd.f32 %v582_v30, %v386_v21 }
 0x1c5   :  { %v422_v54 = vmax.f32 %v387_v49, 0.0 }
 0x1ca   :  { %v389_v22 = vpop.f32.mrf.mxu2 }
 0x1cb   :  { %v390_v47 = vadd.f32 %v582_v30, %v389_v22 }
 0x1cd   :  { %v423_v50 = vmax.f32 %v390_v47, 0.0 }
 0x1d2   :  { %v392_v23 = vpop.f32.mrf.mxu2 }
 0x1d3   :  { %v393_v45 = vadd.f32 %v582_v30, %v392_v23 }
 0x1d5   :  { %v424_v48 = vmax.f32 %v393_v45, 0.0 }
 0x1da   :  { %v395_v24 = vpop.f32.mrf.mxu2 }
 0x1db   :  { %v396_v43 = vadd.f32 %v582_v30, %v395_v24 }
 0x1dd   :  { %v425_v46 = vmax.f32 %v396_v43, 0.0 }
 0x1e2   :  { %v398_v25 = vpop.f32.mrf.mxu2 }
 0x1e3   :  { %v399_v41 = vadd.f32 %v582_v30, %v398_v25 }
 0x1e5   :  { %v426_v44 = vmax.f32 %v399_v41, 0.0 }
 0x1ea   :  { %v401_v26 = vpop.f32.mrf.mxu2 }
 0x1eb   :  { %v402_v39 = vadd.f32 %v582_v30, %v401_v26 }
 0x1ed   :  { %v427_v42 = vmax.f32 %v402_v39, 0.0 }
 0x1f2   :  { %v404_v27 = vpop.f32.mrf.mxu2 }
 0x1f3   :  { %v405_v37 = vadd.f32 %v582_v30, %v404_v27 }
 0x1f5   :  { %v428_v40 = vmax.f32 %v405_v37, 0.0 }
 0x1fa   :  { %v407_v28 = vpop.f32.mrf.mxu2 }
 0x1fb   :  { %v408_v35 = vadd.f32 %v582_v30, %v407_v28 }
 0x1fd   :  { %v429_v38 = vmax.f32 %v408_v35, 0.0 }
 0x202   :  { %v410_v29 = vpop.f32.mrf.mxu2 }
 0x203   :  { %v411_v33 = vadd.f32 %v582_v30, %v410_v29 }
 0x205   :  { %v430_v36 = vmax.f32 %v411_v33, 0.0 }
 0x20a   :  { %v413_v31 = vpop.f32.mrf.mxu2 }
 0x20b   :  { %v414_v32 = vadd.f32 %v582_v30, %v413_v31 }
 0x20d   :  { %v431_v34 = vmax.f32 %v414_v32, 0.0 }
 0x20f   :  { %560 = vmatpush.xpose.msk.msra.mxu3 %vm59_vm0, %v431_v34 }
 0x213   :  { %561 = vmatpush.xpose.msk.msra.mxu3 %vm59_vm0, %v430_v36 }
 0x217   :  { %562 = vmatpush.xpose.msk.msra.mxu3 %vm59_vm0, %v429_v38 }
 0x21b   :  { %563 = vmatpush.xpose.msk.msra.mxu3 %vm59_vm0, %v428_v40 }
 0x21f   :  { %564 = vmatpush.xpose.msk.msra.mxu3 %vm59_vm0, %v427_v42 }
 0x223   :  { %565 = vmatpush.xpose.msk.msra.mxu3 %vm59_vm0, %v426_v44 }
 0x227   :  { %566 = vmatpush.xpose.msk.msra.mxu3 %vm59_vm0, %v425_v46 }
 0x22b   :  { %567 = vmatpush.xpose.msk.msra.mxu3 %vm59_vm0, %v424_v48 }
 0x22f   :  { %568 = vmatpush.xpose.msk.msra.mxu3 %vm59_vm0, %v423_v50 }
 0x233   :  { %569 = vmatpush.xpose.msk.msra.mxu3 %vm59_vm0, %v422_v54 }
 0x237   :  { %570 = vmatpush.xpose.msk.msra.mxu3 %vm59_vm0, %v421_v56 }
 0x23b   :  { %571 = vmatpush.xpose.msk.msra.mxu3 %vm59_vm0, %v420_v58 }
 0x23f   :  { %572 = vmatpush.xpose.msk.msra.mxu3 %vm59_vm0, %v419_v60 }
 0x243   :  { %573 = vmatpush.xpose.msk.msra.mxu3 %vm59_vm0, %v418_v62 }
 0x247   :  { %574 = vmatpush.xpose.msk.msra.mxu3 %vm59_vm0, %v417_v0 }
 0x24b   :  { %575 = vmatpush.xpose.msk.msra.mxu3 %vm59_vm0, %v416_v1 }
 0x24e   :  { %576 = vmatmul.msk.f32.vlgmr.msra.gmra.mxu3 %vm59_vm0, %v432_v2 }
 0x2d1   :  { %v508_v5 = vpop.f32.mrf.mxu3 }
 0x2d2   :  { %v509_v6 = vadd.f32 %v508_v5, %v439_v4 }
 0x2d4   :  { %511 = vst [vmem:[#allocation3] sm:$0x1] %v509_v6 }
 0x2d5   :  { %522 = dma.vmem_to_hbm [thread:$0]  %s518_s10, 16, %s520_s13, [#allocation4]  }
 0x2d6   :  { %607 = dma.done.wait [#allocation4], 16  }
 0x2d7   :  { %608 = vsyncadd [#allocation4], 4294967280 }
 0x2d8   :  { %527 = vsyncpa [#allocation4], 1 }

</bundles_post_ra>
